<compile_context>
chip_gen: v5e
topology: v5e:2x2
jax: 0.10.0
libtpu: 0.0.40
codegen_flags: <defaults>
</compile_context>

<pallas_src>
import functools

import jax
import jax.numpy as jnp
import numpy as np
from jax import lax
from jax.experimental import pallas as pl
from jax.experimental.pallas import tpu as pltpu

EPS = 1e-5


def _conv_bn_relu(act, band_ref, s_up, s_dn, pool_ref, gamma_row, beta_row,
                  inv_rows, mm_dtype):
    """One (conv3x3 -> BN(train) -> ReLU) stage on a (rows, W*C) slab."""

    def mm(a, b):  # conv path; optional bf16 operands, f32 accumulation
        return jnp.dot(a.astype(mm_dtype), b.astype(mm_dtype),
                       preferred_element_type=jnp.float32)

    # dy = +-1 row shifts via 0/1 shift matrices (MXU); boundary rows are zero.
    up = mm(s_up, act)      # row r -> act[r-1]  (zero where y == 0)
    dn = mm(s_dn, act)      # row r -> act[r+1]  (zero where y == H-1)

    # 3x3 conv == 3 banded matmuls (dx taps + channels folded into K).
    conv = (mm(up, band_ref[0])
            + mm(act, band_ref[1])
            + mm(dn, band_ref[2]))                         # (rows, W*Cout) f32

    # BatchNorm, single pass: sum & sum-of-squares, fold W groups via pool
    # matmul (also broadcasts per-channel stats back to every lane).  f32.
    ssum = jnp.sum(conv, axis=0, keepdims=True)            # (1, W*Cout)
    ssq = jnp.sum(conv * conv, axis=0, keepdims=True)      # (1, W*Cout)
    mu = jnp.dot(ssum, pool_ref[...],
                 preferred_element_type=jnp.float32) * inv_rows
    ex2 = jnp.dot(ssq, pool_ref[...],
                  preferred_element_type=jnp.float32) * inv_rows
    var = ex2 - mu * mu                                    # biased variance
    y = (conv - mu) * lax.rsqrt(var + EPS) * gamma_row + beta_row
    return jnp.maximum(y, 0.0)


def double_conv_kernel(x_ref, b1_ref, b2_ref, sup_ref, sdn_ref, pm1_ref,
                       pm2_ref, g1_ref, be1_ref, g2_ref, be2_ref, out_ref,
                       *, mm_dtype):
    rows = x_ref.shape[0]
    inv_rows = 1.0 / rows
    s_up = sup_ref[...]
    s_dn = sdn_ref[...]

    h = _conv_bn_relu(x_ref[...], b1_ref, s_up, s_dn, pm1_ref,
                      g1_ref[...], be1_ref[...], inv_rows, mm_dtype)
    y = _conv_bn_relu(h, b2_ref, s_up, s_dn, pm2_ref,
                      g2_ref[...], be2_ref[...], inv_rows, mm_dtype)
    out_ref[...] = y.astype(out_ref.dtype)


# ----------------------------- wrapper (XLA side) -----------------------------

def _banded_weights(w_hwio, width):
    """(3, 3, Ci, Co) HWIO -> (3, width*Ci, width*Co) block-tridiagonal mats."""
    mats = []
    for dy in range(3):
        m = sum(jnp.kron(jnp.eye(width, k=1 - dx, dtype=w_hwio.dtype),
                         w_hwio[dy, dx])
                for dx in range(3))
        mats.append(m)
    return jnp.stack(mats)


def _channel_pool(width, ch):
    """(width*ch, width*ch): fold W groups per channel and spread back to lanes."""
    return jnp.kron(jnp.ones((width, width), jnp.float32),
                    jnp.eye(ch, dtype=jnp.float32)) / float(width)


def _shift_matrices(n, h):
    rows = n * h
    r = jnp.arange(rows)
    up_ok = (r % h != 0).astype(jnp.float32)[:, None]
    dn_ok = (r % h != h - 1).astype(jnp.float32)[:, None]
    s_up = jnp.eye(rows, k=-1, dtype=jnp.float32) * up_ok   # row r picks r-1
    s_dn = jnp.eye(rows, k=1, dtype=jnp.float32) * dn_ok    # row r picks r+1
    return s_up, s_dn


def double_conv_pallas(x_nchw, w1_oihw, g1, b1, w2_oihw, g2, b2,
                       mm_dtype=jnp.float32):
    """x_nchw: (N, Cin, H, W) f32.  Conv weights in PyTorch OIHW, no bias."""
    N, Cin, H, W = x_nchw.shape
    Cmid = w1_oihw.shape[0]
    Cout = w2_oihw.shape[0]
    rows = N * H

    # Layout plumbing: NCHW -> lane-dense (N*H, W*Cin); OIHW -> HWIO.
    x2d = jnp.transpose(x_nchw, (0, 2, 3, 1)).astype(jnp.float32)
    x2d = x2d.reshape(rows, W * Cin)
    w1_hwio = jnp.transpose(w1_oihw, (2, 3, 1, 0)).astype(jnp.float32)
    w2_hwio = jnp.transpose(w2_oihw, (2, 3, 1, 0)).astype(jnp.float32)

    b1m = _banded_weights(w1_hwio, W)            # (3, W*Cin,  W*Cmid)
    b2m = _banded_weights(w2_hwio, W)            # (3, W*Cmid, W*Cout)
    s_up, s_dn = _shift_matrices(N, H)           # (rows, rows) each
    pm1 = _channel_pool(W, Cmid)                 # (W*Cmid, W*Cmid)
    pm2 = _channel_pool(W, Cout)                 # (W*Cout, W*Cout)
    g1r = jnp.tile(g1.astype(jnp.float32), W).reshape(1, W * Cmid)
    be1r = jnp.tile(b1.astype(jnp.float32), W).reshape(1, W * Cmid)
    g2r = jnp.tile(g2.astype(jnp.float32), W).reshape(1, W * Cout)
    be2r = jnp.tile(b2.astype(jnp.float32), W).reshape(1, W * Cout)

    operands = (x2d, b1m, b2m, s_up, s_dn, pm1, pm2, g1r, be1r, g2r, be2r)
    out_bytes = rows * W * Cout * 4
    resident = sum(int(np.prod(o.shape)) * 4 for o in operands) + out_bytes

    # VMEM budget from actual buffers (+ headroom); valid on v5e/v6e (128 MiB)
    # and v7x (64 MiB).
    vmem_limit = int(min(48 * 2**20, max(16 * 2**20, 8 * resident)))

    mm_flops = 2 * (2 * rows * rows * W * Cin            # conv1 row shifts
                    + 3 * rows * (W * Cin) * (W * Cmid)  # conv1 banded taps
                    + 2 * rows * rows * W * Cmid         # conv2 row shifts
                    + 3 * rows * (W * Cmid) * (W * Cout)  # conv2 banded taps
                    + (W * Cmid) ** 2 + (W * Cout) ** 2)  # BN pooling matmuls
    ew_flops = 12 * rows * W * (Cmid + Cout)              # BN / ReLU elementwise
    cost = pl.CostEstimate(flops=int(mm_flops + ew_flops),
                           transcendentals=int(W * (Cmid + Cout)),
                           bytes_accessed=int(resident))

    vmem = pl.BlockSpec(memory_space=pltpu.MemorySpace.VMEM)
    out2d = pl.pallas_call(
        functools.partial(double_conv_kernel, mm_dtype=mm_dtype),
        out_shape=jax.ShapeDtypeStruct((rows, W * Cout), jnp.float32),
        in_specs=[vmem] * len(operands),
        out_specs=vmem,
        compiler_params=pltpu.CompilerParams(vmem_limit_bytes=vmem_limit),
        cost_estimate=cost,
    )(*operands)

    # Lane-dense (N*H, W*Cout) -> NCHW.
    return jnp.transpose(out2d.reshape(N, H, W, Cout), (0, 3, 1, 2))


# ------------------------------ pure-JAX reference ----------------------------

def double_conv_ref(x_nchw, w1, g1, b1, w2, g2, b2):
    """Pure-JAX reference with PyTorch training-mode BN semantics."""
    def conv(x, w):
        return lax.conv_general_dilated(
            x, w, window_strides=(1, 1), padding=((1, 1), (1, 1)),
            dimension_numbers=('NCHW', 'OIHW', 'NCHW'))

    def bn_relu(x, g, b):
        mu = x.mean(axis=(0, 2, 3), keepdims=True)
        var = ((x - mu) ** 2).mean(axis=(0, 2, 3), keepdims=True)
        y = (x - mu) * lax.rsqrt(var + EPS) * g.reshape(1, -1, 1, 1) \
            + b.reshape(1, -1, 1, 1)
        return jnp.maximum(y, 0.0)

    h = bn_relu(conv(x_nchw, w1), g1, b1)
    return bn_relu(conv(h, w2), g2, b2)


if __name__ == "__main__":
    N, Cin, H, W = 2, 4, 16, 16
    Cout = 8
    Cmid = Cout  # mid_channels defaults to out_channels

    key = jax.random.PRNGKey(0)
    kx, kw1, kw2, kg1, kb1, kg2, kb2 = jax.random.split(key, 7)

    x = jax.random.normal(kx, (N, Cin, H, W), jnp.float32)
    w1 = jax.random.normal(kw1, (Cmid, Cin, 3, 3), jnp.float32) * 0.1   # OIHW
    w2 = jax.random.normal(kw2, (Cout, Cmid, 3, 3), jnp.float32) * 0.1  # OIHW
    g1 = 1.0 + 0.1 * jax.random.normal(kg1, (Cmid,), jnp.float32)
    b1 = 0.1 * jax.random.normal(kb1, (Cmid,), jnp.float32)
    g2 = 1.0 + 0.1 * jax.random.normal(kg2, (Cout,), jnp.float32)
    b2 = 0.1 * jax.random.normal(kb2, (Cout,), jnp.float32)

    out = double_conv_pallas(x, w1, g1, b1, w2, g2, b2)
    out = jax.block_until_ready(out)

    ref = jax.block_until_ready(double_conv_ref(x, w1, g1, b1, w2, g2, b2))
    np.testing.assert_allclose(np.asarray(out), np.asarray(ref),
                               rtol=1e-4, atol=1e-4)

    print("KERNEL_OK")
</pallas_src>

<mosaic_0001>
module attributes {stable_mosaic.version = 11 : i64} {
  func.func @double_conv_kernel(%arg0: memref<32x64xf32, #tpu.memory_space<vmem>>, %arg1: memref<3x64x128xf32, #tpu.memory_space<vmem>>, %arg2: memref<3x128x128xf32, #tpu.memory_space<vmem>>, %arg3: memref<32x32xf32, #tpu.memory_space<vmem>>, %arg4: memref<32x32xf32, #tpu.memory_space<vmem>>, %arg5: memref<128x128xf32, #tpu.memory_space<vmem>>, %arg6: memref<128x128xf32, #tpu.memory_space<vmem>>, %arg7: memref<1x128xf32, #tpu.memory_space<vmem>>, %arg8: memref<1x128xf32, #tpu.memory_space<vmem>>, %arg9: memref<1x128xf32, #tpu.memory_space<vmem>>, %arg10: memref<1x128xf32, #tpu.memory_space<vmem>>, %arg11: memref<32x128xf32, #tpu.memory_space<vmem>>) attributes {dimension_semantics = [], scalar_prefetch = 0 : i64, scratch_operands = 0 : i64, tpu.core_type = #tpu.core_type<tc>} {
    %c0 = arith.constant 0 : index
    %c0_0 = arith.constant 0 : index
    %0 = vector.load %arg3[%c0, %c0_0] : memref<32x32xf32, #tpu.memory_space<vmem>>, vector<32x32xf32>
    %c0_1 = arith.constant 0 : index
    %c0_2 = arith.constant 0 : index
    %1 = vector.load %arg4[%c0_1, %c0_2] : memref<32x32xf32, #tpu.memory_space<vmem>>, vector<32x32xf32>
    %c0_3 = arith.constant 0 : index
    %c0_4 = arith.constant 0 : index
    %2 = vector.load %arg0[%c0_3, %c0_4] : memref<32x64xf32, #tpu.memory_space<vmem>>, vector<32x64xf32>
    %c0_5 = arith.constant 0 : index
    %c0_6 = arith.constant 0 : index
    %3 = vector.load %arg7[%c0_5, %c0_6] : memref<1x128xf32, #tpu.memory_space<vmem>>, vector<1x128xf32>
    %c0_7 = arith.constant 0 : index
    %c0_8 = arith.constant 0 : index
    %4 = vector.load %arg8[%c0_7, %c0_8] : memref<1x128xf32, #tpu.memory_space<vmem>>, vector<1x128xf32>
    %cst = arith.constant dense<0.000000e+00> : vector<32x64xf32>
    %5 = tpu.matmul %0, %2, %cst {dimension_numbers = #tpu.dot_dimension_numbers<[1], [0], [0], [1], [0, 0, 1, 1], [], []>} : vector<32x32xf32>, vector<32x64xf32>, vector<32x64xf32> -> vector<32x64xf32>
    %cst_9 = arith.constant dense<0.000000e+00> : vector<32x64xf32>
    %6 = tpu.matmul %1, %2, %cst_9 {dimension_numbers = #tpu.dot_dimension_numbers<[1], [0], [0], [1], [0, 0, 1, 1], [], []>} : vector<32x32xf32>, vector<32x64xf32>, vector<32x64xf32> -> vector<32x64xf32>
    %c0_10 = arith.constant 0 : index
    %c0_11 = arith.constant 0 : index
    %c0_12 = arith.constant 0 : index
    %7 = vector.load %arg1[%c0_10, %c0_11, %c0_12] : memref<3x64x128xf32, #tpu.memory_space<vmem>>, vector<1x64x128xf32>
    %8 = vector.shape_cast %7 : vector<1x64x128xf32> to vector<64x128xf32>
    %cst_13 = arith.constant dense<0.000000e+00> : vector<32x128xf32>
    %9 = tpu.matmul %5, %8, %cst_13 {dimension_numbers = #tpu.dot_dimension_numbers<[1], [0], [0], [1], [0, 0, 1, 1], [], []>} : vector<32x64xf32>, vector<64x128xf32>, vector<32x128xf32> -> vector<32x128xf32>
    %c1 = arith.constant 1 : index
    %c0_14 = arith.constant 0 : index
    %c0_15 = arith.constant 0 : index
    %10 = vector.load %arg1[%c1, %c0_14, %c0_15] : memref<3x64x128xf32, #tpu.memory_space<vmem>>, vector<1x64x128xf32>
    %11 = vector.shape_cast %10 : vector<1x64x128xf32> to vector<64x128xf32>
    %cst_16 = arith.constant dense<0.000000e+00> : vector<32x128xf32>
    %12 = tpu.matmul %2, %11, %cst_16 {dimension_numbers = #tpu.dot_dimension_numbers<[1], [0], [0], [1], [0, 0, 1, 1], [], []>} : vector<32x64xf32>, vector<64x128xf32>, vector<32x128xf32> -> vector<32x128xf32>
    %13 = arith.addf %9, %12 : vector<32x128xf32>
    %c2 = arith.constant 2 : index
    %c0_17 = arith.constant 0 : index
    %c0_18 = arith.constant 0 : index
    %14 = vector.load %arg1[%c2, %c0_17, %c0_18] : memref<3x64x128xf32, #tpu.memory_space<vmem>>, vector<1x64x128xf32>
    %15 = vector.shape_cast %14 : vector<1x64x128xf32> to vector<64x128xf32>
    %cst_19 = arith.constant dense<0.000000e+00> : vector<32x128xf32>
    %16 = tpu.matmul %6, %15, %cst_19 {dimension_numbers = #tpu.dot_dimension_numbers<[1], [0], [0], [1], [0, 0, 1, 1], [], []>} : vector<32x64xf32>, vector<64x128xf32>, vector<32x128xf32> -> vector<32x128xf32>
    %17 = arith.addf %13, %16 : vector<32x128xf32>
    %cst_20 = arith.constant dense<0.000000e+00> : vector<128xf32>
    %18 = vector.multi_reduction <add>, %17, %cst_20 [0] : vector<32x128xf32> to vector<128xf32>
    %19 = vector.shape_cast %18 : vector<128xf32> to vector<1x128xf32>
    %20 = arith.mulf %17, %17 : vector<32x128xf32>
    %cst_21 = arith.constant dense<0.000000e+00> : vector<128xf32>
    %21 = vector.multi_reduction <add>, %20, %cst_21 [0] : vector<32x128xf32> to vector<128xf32>
    %22 = vector.shape_cast %21 : vector<128xf32> to vector<1x128xf32>
    %c0_22 = arith.constant 0 : index
    %c0_23 = arith.constant 0 : index
    %23 = vector.load %arg5[%c0_22, %c0_23] : memref<128x128xf32, #tpu.memory_space<vmem>>, vector<128x128xf32>
    %cst_24 = arith.constant dense<0.000000e+00> : vector<1x128xf32>
    %24 = tpu.matmul %19, %23, %cst_24 {dimension_numbers = #tpu.dot_dimension_numbers<[1], [0], [0], [1], [0, 0, 1, 1], [], []>} : vector<1x128xf32>, vector<128x128xf32>, vector<1x128xf32> -> vector<1x128xf32>
    %cst_25 = arith.constant 3.125000e-02 : f32
    %25 = vector.broadcast %cst_25 : f32 to vector<1x128xf32>
    %26 = arith.mulf %24, %25 : vector<1x128xf32>
    %c0_26 = arith.constant 0 : index
    %c0_27 = arith.constant 0 : index
    %27 = vector.load %arg5[%c0_26, %c0_27] : memref<128x128xf32, #tpu.memory_space<vmem>>, vector<128x128xf32>
    %cst_28 = arith.constant dense<0.000000e+00> : vector<1x128xf32>
    %28 = tpu.matmul %22, %27, %cst_28 {dimension_numbers = #tpu.dot_dimension_numbers<[1], [0], [0], [1], [0, 0, 1, 1], [], []>} : vector<1x128xf32>, vector<128x128xf32>, vector<1x128xf32> -> vector<1x128xf32>
    %cst_29 = arith.constant 3.125000e-02 : f32
    %29 = vector.broadcast %cst_29 : f32 to vector<1x128xf32>
    %30 = arith.mulf %28, %29 : vector<1x128xf32>
    %31 = arith.mulf %26, %26 : vector<1x128xf32>
    %32 = arith.subf %30, %31 : vector<1x128xf32>
    %33 = vector.broadcast %26 : vector<1x128xf32> to vector<32x128xf32>
    %34 = arith.subf %17, %33 : vector<32x128xf32>
    %cst_30 = arith.constant 9.99999974E-6 : f32
    %35 = vector.broadcast %cst_30 : f32 to vector<1x128xf32>
    %36 = arith.addf %32, %35 : vector<1x128xf32>
    %37 = math.rsqrt %36 : vector<1x128xf32>
    %38 = vector.broadcast %37 : vector<1x128xf32> to vector<32x128xf32>
    %39 = arith.mulf %34, %38 : vector<32x128xf32>
    %40 = vector.broadcast %3 : vector<1x128xf32> to vector<32x128xf32>
    %41 = arith.mulf %39, %40 : vector<32x128xf32>
    %42 = vector.broadcast %4 : vector<1x128xf32> to vector<32x128xf32>
    %43 = arith.addf %41, %42 : vector<32x128xf32>
    %cst_31 = arith.constant 0.000000e+00 : f32
    %44 = vector.broadcast %cst_31 : f32 to vector<32x128xf32>
    %45 = arith.maximumf %43, %44 : vector<32x128xf32>
    %c0_32 = arith.constant 0 : index
    %c0_33 = arith.constant 0 : index
    %46 = vector.load %arg9[%c0_32, %c0_33] : memref<1x128xf32, #tpu.memory_space<vmem>>, vector<1x128xf32>
    %c0_34 = arith.constant 0 : index
    %c0_35 = arith.constant 0 : index
    %47 = vector.load %arg10[%c0_34, %c0_35] : memref<1x128xf32, #tpu.memory_space<vmem>>, vector<1x128xf32>
    %cst_36 = arith.constant dense<0.000000e+00> : vector<32x128xf32>
    %48 = tpu.matmul %0, %45, %cst_36 {dimension_numbers = #tpu.dot_dimension_numbers<[1], [0], [0], [1], [0, 0, 1, 1], [], []>} : vector<32x32xf32>, vector<32x128xf32>, vector<32x128xf32> -> vector<32x128xf32>
    %cst_37 = arith.constant dense<0.000000e+00> : vector<32x128xf32>
    %49 = tpu.matmul %1, %45, %cst_37 {dimension_numbers = #tpu.dot_dimension_numbers<[1], [0], [0], [1], [0, 0, 1, 1], [], []>} : vector<32x32xf32>, vector<32x128xf32>, vector<32x128xf32> -> vector<32x128xf32>
    %c0_38 = arith.constant 0 : index
    %c0_39 = arith.constant 0 : index
    %c0_40 = arith.constant 0 : index
    %50 = vector.load %arg2[%c0_38, %c0_39, %c0_40] : memref<3x128x128xf32, #tpu.memory_space<vmem>>, vector<1x128x128xf32>
    %51 = vector.shape_cast %50 : vector<1x128x128xf32> to vector<128x128xf32>
    %cst_41 = arith.constant dense<0.000000e+00> : vector<32x128xf32>
    %52 = tpu.matmul %48, %51, %cst_41 {dimension_numbers = #tpu.dot_dimension_numbers<[1], [0], [0], [1], [0, 0, 1, 1], [], []>} : vector<32x128xf32>, vector<128x128xf32>, vector<32x128xf32> -> vector<32x128xf32>
    %c1_42 = arith.constant 1 : index
    %c0_43 = arith.constant 0 : index
    %c0_44 = arith.constant 0 : index
    %53 = vector.load %arg2[%c1_42, %c0_43, %c0_44] : memref<3x128x128xf32, #tpu.memory_space<vmem>>, vector<1x128x128xf32>
    %54 = vector.shape_cast %53 : vector<1x128x128xf32> to vector<128x128xf32>
    %cst_45 = arith.constant dense<0.000000e+00> : vector<32x128xf32>
    %55 = tpu.matmul %45, %54, %cst_45 {dimension_numbers = #tpu.dot_dimension_numbers<[1], [0], [0], [1], [0, 0, 1, 1], [], []>} : vector<32x128xf32>, vector<128x128xf32>, vector<32x128xf32> -> vector<32x128xf32>
    %56 = arith.addf %52, %55 : vector<32x128xf32>
    %c2_46 = arith.constant 2 : index
    %c0_47 = arith.constant 0 : index
    %c0_48 = arith.constant 0 : index
    %57 = vector.load %arg2[%c2_46, %c0_47, %c0_48] : memref<3x128x128xf32, #tpu.memory_space<vmem>>, vector<1x128x128xf32>
    %58 = vector.shape_cast %57 : vector<1x128x128xf32> to vector<128x128xf32>
    %cst_49 = arith.constant dense<0.000000e+00> : vector<32x128xf32>
    %59 = tpu.matmul %49, %58, %cst_49 {dimension_numbers = #tpu.dot_dimension_numbers<[1], [0], [0], [1], [0, 0, 1, 1], [], []>} : vector<32x128xf32>, vector<128x128xf32>, vector<32x128xf32> -> vector<32x128xf32>
    %60 = arith.addf %56, %59 : vector<32x128xf32>
    %cst_50 = arith.constant dense<0.000000e+00> : vector<128xf32>
    %61 = vector.multi_reduction <add>, %60, %cst_50 [0] : vector<32x128xf32> to vector<128xf32>
    %62 = vector.shape_cast %61 : vector<128xf32> to vector<1x128xf32>
    %63 = arith.mulf %60, %60 : vector<32x128xf32>
    %cst_51 = arith.constant dense<0.000000e+00> : vector<128xf32>
    %64 = vector.multi_reduction <add>, %63, %cst_51 [0] : vector<32x128xf32> to vector<128xf32>
    %65 = vector.shape_cast %64 : vector<128xf32> to vector<1x128xf32>
    %c0_52 = arith.constant 0 : index
    %c0_53 = arith.constant 0 : index
    %66 = vector.load %arg6[%c0_52, %c0_53] : memref<128x128xf32, #tpu.memory_space<vmem>>, vector<128x128xf32>
    %cst_54 = arith.constant dense<0.000000e+00> : vector<1x128xf32>
    %67 = tpu.matmul %62, %66, %cst_54 {dimension_numbers = #tpu.dot_dimension_numbers<[1], [0], [0], [1], [0, 0, 1, 1], [], []>} : vector<1x128xf32>, vector<128x128xf32>, vector<1x128xf32> -> vector<1x128xf32>
    %cst_55 = arith.constant 3.125000e-02 : f32
    %68 = vector.broadcast %cst_55 : f32 to vector<1x128xf32>
    %69 = arith.mulf %67, %68 : vector<1x128xf32>
    %c0_56 = arith.constant 0 : index
    %c0_57 = arith.constant 0 : index
    %70 = vector.load %arg6[%c0_56, %c0_57] : memref<128x128xf32, #tpu.memory_space<vmem>>, vector<128x128xf32>
    %cst_58 = arith.constant dense<0.000000e+00> : vector<1x128xf32>
    %71 = tpu.matmul %65, %70, %cst_58 {dimension_numbers = #tpu.dot_dimension_numbers<[1], [0], [0], [1], [0, 0, 1, 1], [], []>} : vector<1x128xf32>, vector<128x128xf32>, vector<1x128xf32> -> vector<1x128xf32>
    %cst_59 = arith.constant 3.125000e-02 : f32
    %72 = vector.broadcast %cst_59 : f32 to vector<1x128xf32>
    %73 = arith.mulf %71, %72 : vector<1x128xf32>
    %74 = arith.mulf %69, %69 : vector<1x128xf32>
    %75 = arith.subf %73, %74 : vector<1x128xf32>
    %76 = vector.broadcast %69 : vector<1x128xf32> to vector<32x128xf32>
    %77 = arith.subf %60, %76 : vector<32x128xf32>
    %cst_60 = arith.constant 9.99999974E-6 : f32
    %78 = vector.broadcast %cst_60 : f32 to vector<1x128xf32>
    %79 = arith.addf %75, %78 : vector<1x128xf32>
    %80 = math.rsqrt %79 : vector<1x128xf32>
    %81 = vector.broadcast %80 : vector<1x128xf32> to vector<32x128xf32>
    %82 = arith.mulf %77, %81 : vector<32x128xf32>
    %83 = vector.broadcast %46 : vector<1x128xf32> to vector<32x128xf32>
    %84 = arith.mulf %82, %83 : vector<32x128xf32>
    %85 = vector.broadcast %47 : vector<1x128xf32> to vector<32x128xf32>
    %86 = arith.addf %84, %85 : vector<32x128xf32>
    %cst_61 = arith.constant 0.000000e+00 : f32
    %87 = vector.broadcast %cst_61 : f32 to vector<32x128xf32>
    %88 = arith.maximumf %86, %87 : vector<32x128xf32>
    %c0_62 = arith.constant 0 : index
    %c0_63 = arith.constant 0 : index
    %89 = vector.load %arg11[%c0_62, %c0_63] : memref<32x128xf32, #tpu.memory_space<vmem>>, vector<32x128xf32>
    tpu.vector_store %arg11[%c0_62, %c0_63], %88 {strides = array<i32>} : memref<32x128xf32, #tpu.memory_space<vmem>>, vector<32x128xf32>,
    return
  }
}

</mosaic_0001>

<bundles_post_ra>
// kernel: tpu_custom_call.1
= control target key start
LH: loop header
LB: loop body
LE: loop exit
PB: predicated region body
PF: predicated region fallthrough
CT: control target
= control target key end

     0   :  { %16 = vsyncpa [#allocation3], 0  ;;  %s1358_s0 = inlined_call_operand.hbm [shape: f32[32,64], index: 0, kind: input, shape index: {}]   ;;  %s1359_s1 = inlined_call_operand.hbm [shape: f32[3,64,128], index: 1, kind: input, shape index: {}]   ;;  %s1360_s2 = inlined_call_operand.hbm [shape: f32[3,128,128], index: 2, kind: input, shape index: {}]   ;;  %s1361_s3 = inlined_call_operand.hbm [shape: f32[32,32], index: 3, kind: input, shape index: {}]   ;;  %s1362_s4 = inlined_call_operand.hbm [shape: f32[32,32], index: 4, kind: input, shape index: {}]   ;;  %s1363_s5 = inlined_call_operand.hbm [shape: f32[128,128], index: 5, kind: input, shape index: {}]   ;;  %s1364_s6 = inlined_call_operand.hbm [shape: f32[128,128], index: 6, kind: input, shape index: {}]   ;;  %s1365_s7 = inlined_call_operand.vmem [shape: f32[1,128], index: 7, kind: input, shape index: {}]   ;;  %s1366_s8 = inlined_call_operand.vmem [shape: f32[1,128], index: 8, kind: input, shape index: {}]   ;;  %s1367_s9 = inlined_call_operand.vmem [shape: f32[1,128], index: 9, kind: input, shape index: {}]   ;;  %s1368_s10 = inlined_call_operand.vmem [shape: f32[1,128], index: 10, kind: input, shape index: {}]   ;;  %s1369_s11 = inlined_call_operand.hbm [shape: f32[32,128], index: 11, kind: output, shape index: {}]  }
   0x1   :  { %17 = vsyncpa [#allocation6], 0 }
   0x2   :  { %18 = vsyncpa [#allocation9], 0 }
   0x3   :  { %19 = vsyncpa [#allocation12], 0 }
   0x4   :  { %20 = vsyncpa [#allocation4], 0  ;;  %s38_s19 = sshll.u32 %s1359_s1, 4  ;;  %s1120_s20 = smov [#allocation5]   ;;  %s39_s19 = int_to_ptr.hbm [resolvable:$true] %s38_s19 }
   0x5   :  { %s40_s21 = sshll.u32 %s1120_s20, 4  ;;  %s64_s24 = sshll.u32 %s1361_s3, 4  ;;  %s41_s21 = int_to_ptr.vmem [resolvable:$true] %s40_s21  ;;  %s65_s24 = int_to_ptr.hbm [resolvable:$true] %s64_s24 }
   0x6   :  { %s1121_s25 = smov 128   ;;  %s1122_s26 = smov 8  }
   0x7   :  { %46 = dma.hbm_to_vmem [thread:$0]  %s39_s19, 3072, %s41_s21, [#allocation6], %s1121_s25, %s1121_s25, %s1122_s26  }
   0x8   :  { %s1123_s27 = smov [#allocation8]   ;;  %s90_s1 = sshll.u32 %s1363_s5, 4  ;;  %s91_s1 = int_to_ptr.hbm [resolvable:$true] %s90_s1 }
   0x9   :  { %s66_s28 = sshll.u32 %s1123_s27, 4  ;;  %s25_s13 = sshll.u32 %s1358_s0, 4  ;;  %s67_s28 = int_to_ptr.vmem [resolvable:$true] %s66_s28  ;;  %s26_s13 = int_to_ptr.hbm [resolvable:$true] %s25_s13 }
   0xa   :  { %72 = dma.hbm_to_vmem [thread:$0]  %s65_s24, 512, %s67_s28, [#allocation9], %s1121_s25, %s1121_s25, %s1122_s26  }
   0xb   :  { %s1124_s14 = smov [#allocation11]   ;;  %s1125_s16 = smov [#allocation2]  }
   0xc   :  { %s92_s15 = sshll.u32 %s1124_s14, 4  ;;  %s27_s5 = sshll.u32 %s1125_s16, 4  ;;  %s93_s15 = int_to_ptr.vmem [resolvable:$true] %s92_s15  ;;  %s28_s5 = int_to_ptr.vmem [resolvable:$true] %s27_s5 }
   0xd   :  { %98 = dma.hbm_to_vmem [thread:$0]  %s91_s1, 2048, %s93_s15, [#allocation12], %s1121_s25, %s1121_s25, %s1122_s26  }
   0xe   :  { %s51_s19 = sshll.u32 %s1360_s2, 4  ;;  %s77_s21 = sshll.u32 %s1362_s4, 4  ;;  %s52_s19 = int_to_ptr.hbm [resolvable:$true] %s51_s19  ;;  %s78_s21 = int_to_ptr.hbm [resolvable:$true] %s77_s21 }
   0xf   :  { %33 = dma.hbm_to_vmem [thread:$0]  %s26_s13, 512, %s28_s5, [#allocation3], %s1121_s25, %s1121_s25, %s1122_s26  }
  0x10   :  { %s1126_s22 = smov [#allocation7]   ;;  %s1127_s24 = smov [#allocation10]  }
  0x11   :  { %s53_s23 = sshll.u32 %s1126_s22, 4  ;;  %s79_s2 = sshll.u32 %s1127_s24, 4  ;;  %s54_s23 = int_to_ptr.vmem [resolvable:$true] %s53_s23  ;;  %s80_s2 = int_to_ptr.vmem [resolvable:$true] %s79_s2 }
  0x12   :  { %59 = dma.hbm_to_vmem [thread:$0]  %s52_s19, 6144, %s54_s23, [#allocation6], %s1121_s25, %s1121_s25, %s1122_s26  }
  0x13   :  { %s103_s29 = sshll.u32 %s1364_s6, 4  ;;  %s1128_s4 = smov [#allocation13]   ;;  %s104_s29 = int_to_ptr.hbm [resolvable:$true] %s103_s29 }
  0x14   :  { %85 = dma.hbm_to_vmem [thread:$0]  %s78_s21, 512, %s80_s2, [#allocation9], %s1121_s25, %s1121_s25, %s1122_s26  }
  0x15   :  { %s105_s30 = sshll.u32 %s1128_s4, 4  ;;  %s106_s30 = int_to_ptr.vmem [resolvable:$true] %s105_s30 }
  0x16   :  { %111 = dma.hbm_to_vmem [thread:$0]  %s104_s29, 2048, %s106_s30, [#allocation12], %s1121_s25, %s1121_s25, %s1122_s26  }
  0x17   :  { %1110 = dma.done.wait [#allocation3], 512  }
  0x18   :  { %1111 = vsyncadd [#allocation3], 4294966784 }
  0x19   :  { %1112 = dma.done.wait [#allocation6], 9216  }
  0x1a   :  { %1113 = vsyncadd [#allocation6], 4294958080 }
  0x1b   :  { %1114 = dma.done.wait [#allocation9], 1024  }
  0x1c   :  { %1115 = vsyncadd [#allocation9], 4294966272 }
  0x1d   :  { %1116 = dma.done.wait [#allocation12], 4096  }
  0x1e   :  { %1117 = vsyncadd [#allocation12], 4294963200  ;;  %v1232_v0 = vld [vmem:[#allocation2 + $0x18] sm:$0xff]  ;;  %v1234_v1 = vld [vmem:[#allocation2 + $0x10] sm:$0xff]  ;;  %vm162_vm0 = vcmask 261120   ;;  %vm262_vm1 = vcmask 523264  }
  0x1f   :  { %187 = vmatpush.msra.mxu0 %v1232_v0  ;;  %228 = vmatpush.msra.mxu1 %v1232_v0  ;;  %v1238_v2 = vld [vmem:[#allocation2 + $0x8] sm:$0xff]  ;;  %v1243_v3 = vld [vmem:[#allocation2] sm:$0xff]  ;;  %v261_v4 = vld [vmem:[#allocation5 + $0x78] sm:$0xff]  ;;  %s852_s17 = sshll.u32 %s1369_s11, 4  ;;  %s853_s17 = int_to_ptr.hbm [resolvable:$true] %s852_s17 }
  0x20   :  { %896 = vmatpush.msra.mxu3 %v1232_v0  ;;  %v1247_v5 = vld [vmem:[#allocation8] sm:$0xff]  ;;  %283 = vmatpush.msra.mxu2 %v261_v4  ;;  %v260_v7 = vld [vmem:[#allocation5 + $0x70] sm:$0xff]  ;;  %v353_v9 = vld [vmem:[#allocation5 + $0xb8] sm:$0xff] }
  0x21   :  { %188 = vmatpush.msra.mxu0 %v1234_v1  ;;  %229 = vmatpush.msra.mxu1 %v1234_v1  ;;  %v1250_v6 = vld [vmem:[#allocation10] sm:$0xff]  ;;  %v1255_v8 = vld [vmem:[#allocation8 + $0x10] sm:$0xff]  ;;  %v252_v10 = vld [vmem:[#allocation5 + $0x38] sm:$0xff] }
  0x22   :  { %897 = vmatpush.msra.mxu3 %v1234_v1  ;;  %v251_v11 = vld [vmem:[#allocation5 + $0x30] sm:$0xff]  ;;  %v259_v12 = vld [vmem:[#allocation5 + $0x68] sm:$0xff]  ;;  %284 = vmatpush.msra.mxu2 %v260_v7  ;;  %v258_v13 = vld [vmem:[#allocation5 + $0x60] sm:$0xff] }
  0x23   :  { %189 = vmatpush.msra.mxu0 %v1238_v2  ;;  %230 = vmatpush.msra.mxu1 %v1238_v2  ;;  %v352_v14 = vld [vmem:[#allocation5 + $0xb0] sm:$0xff]  ;;  %v351_v15 = vld [vmem:[#allocation5 + $0xa8] sm:$0xff]  ;;  %v257_v17 = vld [vmem:[#allocation5 + $0x58] sm:$0xff] }
  0x24   :  { %898 = vmatpush.msra.mxu3 %v1238_v2  ;;  %285 = vmatpush.msra.mxu2 %v259_v12  ;;  %v250_v16 = vld [vmem:[#allocation5 + $0x28] sm:$0xff]  ;;  %v249_v20 = vld [vmem:[#allocation5 + $0x20] sm:$0xff]  ;;  %v256_v21 = vld [vmem:[#allocation5 + $0x50] sm:$0xff] }
  0x25   :  { %190 = vmatpush.msra.mxu0 %v1243_v3  ;;  %231 = vmatpush.msra.mxu1 %v1243_v3  ;;  %v1264_v18 = vld [vmem:[#allocation8 + $0x8] sm:$0xff]  ;;  %v1268_v22 = vld [vmem:[#allocation8 + $0x18] sm:$0xff]  ;;  %v247_v25 = vld [vmem:[#allocation5 + $0x10] sm:$0xff] }
  0x26   :  { %868 = vmatmul.msk.f32.vlgmr.msra.gmra.mxu0 %vm162_vm0, %v1247_v5  ;;  %872 = vmatmul.msk.f32.vlgmr.msra.gmra.mxu1 %vm162_vm0, %v1250_v6  ;;  %v1266_v19 = vld [vmem:[#allocation10 + $0x8] sm:$0xff]  ;;  %v248_v23 = vld [vmem:[#allocation5 + $0x18] sm:$0xff]  ;;  %v1276_v27 = vld [vmem:[#allocation10 + $0x10] sm:$0xff] }
  0x27   :  { %899 = vmatpush.msra.mxu3 %v1243_v3  ;;  %374 = vmatpush.msrb.mxu0 %v353_v9  ;;  %v255_v24 = vld [vmem:[#allocation5 + $0x48] sm:$0xff]  ;;  %v1280_v28 = vld [vmem:[#allocation10 + $0x18] sm:$0xff]  ;;  %v254_v29 = vld [vmem:[#allocation5 + $0x40] sm:$0xff] }
  0x28   :  { %870 = vmatmul.msk.f32.vlgmr.msra.gmra.mxu3 %vm162_vm0, %v1255_v8  ;;  %286 = vmatpush.msra.mxu2 %v258_v13  ;;  %v246_v26 = vld [vmem:[#allocation5 + $0x8] sm:$0xff]  ;;  %v245_v30 = vld [vmem:[#allocation5] sm:$0xff]  ;;  %v349_v32 = vld [vmem:[#allocation5 + $0x98] sm:$0xff] }
  0x29   :  { %324 = vmatpush.msrb.mxu3 %v252_v10  ;;  %375 = vmatpush.msrb.mxu0 %v352_v14  ;;  %v350_v31 = vld [vmem:[#allocation5 + $0xa0] sm:$0xff]  ;;  %v348_v33 = vld [vmem:[#allocation5 + $0x90] sm:$0xff]  ;;  %v347_v34 = vld [vmem:[#allocation5 + $0x88] sm:$0xff] }
  0x2a   :  { %287 = vmatpush.msra.mxu2 %v257_v17  ;;  %v346_v35 = vld [vmem:[#allocation5 + $0x80] sm:$0xff]  ;;  %v436_v44 = vld [vmem:[#allocation11 + $0x78] sm:$0xff]  ;;  %v435_v45 = vld [vmem:[#allocation11 + $0x70] sm:$0xff] }
  0x2b   :  { %325 = vmatpush.msrb.mxu3 %v251_v11  ;;  %376 = vmatpush.msrb.mxu0 %v351_v15  ;;  %v434_v46 = vld [vmem:[#allocation11 + $0x68] sm:$0xff]  ;;  %v433_v47 = vld [vmem:[#allocation11 + $0x60] sm:$0xff]  ;;  %v432_v48 = vld [vmem:[#allocation11 + $0x58] sm:$0xff] }
  0x2c   :  { %288 = vmatpush.msra.mxu2 %v256_v21  ;;  %437 = vmatpush.msrb.mxu1 %v436_v44  ;;  %v431_v49 = vld [vmem:[#allocation11 + $0x50] sm:$0xff]  ;;  %v430_v50 = vld [vmem:[#allocation11 + $0x48] sm:$0xff]  ;;  %v429_v52 = vld [vmem:[#allocation11 + $0x40] sm:$0xff] }
  0x2d   :  { %326 = vmatpush.msrb.mxu3 %v250_v16  ;;  %377 = vmatpush.msrb.mxu0 %v350_v31  ;;  %v428_v54 = vld [vmem:[#allocation11 + $0x38] sm:$0xff]  ;;  %v427_v55 = vld [vmem:[#allocation11 + $0x30] sm:$0xff]  ;;  %v426_v56 = vld [vmem:[#allocation11 + $0x28] sm:$0xff] }
  0x2e   :  { %869 = vmatmul.msk.f32.gmra.mxu0 %vm162_vm0, %v1264_v18  ;;  %873 = vmatmul.msk.f32.gmra.mxu1 %vm162_vm0, %v1266_v19  ;;  %v425_v58 = vld [vmem:[#allocation11 + $0x20] sm:$0xff]  ;;  %v424_v59 = vld [vmem:[#allocation11 + $0x18] sm:$0xff]  ;;  %v423_v61 = vld [vmem:[#allocation11 + $0x10] sm:$0xff] }
  0x2f   :  { %327 = vmatpush.msrb.mxu3 %v249_v20  ;;  %289 = vmatpush.msra.mxu2 %v255_v24  ;;  %v422_v63 = vld [vmem:[#allocation11 + $0x8] sm:$0xff] }
  0x30   :  { %871 = vmatmul.msk.f32.gmra.mxu3 %vm162_vm0, %v1268_v22  ;;  %378 = vmatpush.msrb.mxu0 %v349_v32 }
  0x31   :  { %328 = vmatpush.msrb.mxu3 %v248_v23  ;;  %290 = vmatpush.msra.mxu2 %v254_v29 }
  0x32   :  { %876 = vmatmul.msk.f32.vlgmr.msra.gmra.mxu2 %vm262_vm1, %v1243_v3  ;;  %379 = vmatpush.msrb.mxu0 %v348_v33 }
  0x33   :  { %329 = vmatpush.msrb.mxu3 %v247_v25  ;;  %458 = vmatpush.msrb.mxu2 %v436_v44 }
  0x34   :  { %380 = vmatpush.msrb.mxu0 %v347_v34  ;;  %438 = vmatpush.msrb.mxu1 %v435_v45 }
  0x35   :  { %330 = vmatpush.msrb.mxu3 %v246_v26  ;;  %459 = vmatpush.msrb.mxu2 %v435_v45 }
  0x36   :  { %874 = vmatmul.msk.f32.gmra.mxu1 %vm162_vm0, %v1276_v27  ;;  %381 = vmatpush.msrb.mxu0 %v346_v35 }
  0x37   :  { %331 = vmatpush.msrb.mxu3 %v245_v30  ;;  %439 = vmatpush.msrb.mxu1 %v434_v46 }
  0x38   :  { %460 = vmatpush.msrb.mxu2 %v434_v46  ;;  %v612_v46 = vld [vmem:[#allocation7 + $0xf8] sm:$0xff] }
  0x39   :  { %440 = vmatpush.msrb.mxu1 %v433_v47  ;;  %613 = vmatpush.msra.mxu0 %v612_v46  ;;  %v685_v46 = vld [vmem:[#allocation7 + $0x168] sm:$0xff] }
  0x3a   :  { %877 = vmatmul.msk.f32.gmra.mxu2 %vm262_vm1, %v1238_v2 }
  0x3b   :  { %461 = vmatpush.msrb.mxu2 %v433_v47  ;;  %441 = vmatpush.msrb.mxu1 %v432_v48  ;;  %v611_v47 = vld [vmem:[#allocation7 + $0xf0] sm:$0xff] }
  0x3c   :  { %614 = vmatpush.msra.mxu0 %v611_v47  ;;  %v595_v47 = vld [vmem:[#allocation7 + $0x78] sm:$0xff] }
  0x3d   :  { %462 = vmatpush.msrb.mxu2 %v432_v48  ;;  %442 = vmatpush.msrb.mxu1 %v431_v49  ;;  %v610_v48 = vld [vmem:[#allocation7 + $0xe8] sm:$0xff] }
  0x3e   :  { %875 = vmatmul.msk.f32.gmra.mxu1 %vm162_vm0, %v1280_v28  ;;  %615 = vmatpush.msra.mxu0 %v610_v48  ;;  %v684_v48 = vld [vmem:[#allocation7 + $0x160] sm:$0xff] }
  0x3f   :  { %463 = vmatpush.msrb.mxu2 %v431_v49  ;;  %443 = vmatpush.msrb.mxu1 %v430_v50  ;;  %v609_v49 = vld [vmem:[#allocation7 + $0xe0] sm:$0xff] }
  0x40   :  { %616 = vmatpush.msra.mxu0 %v609_v49  ;;  %v594_v49 = vld [vmem:[#allocation7 + $0x70] sm:$0xff] }
  0x41   :  { %464 = vmatpush.msrb.mxu2 %v430_v50  ;;  %444 = vmatpush.msrb.mxu1 %v429_v52  ;;  %v608_v50 = vld [vmem:[#allocation7 + $0xd8] sm:$0xff] }
  0x42   :  { %878 = vmatmul.msk.f32.gmra.mxu2 %vm262_vm1, %v1234_v1  ;;  %617 = vmatpush.msra.mxu0 %v608_v50  ;;  %v683_v50 = vld [vmem:[#allocation7 + $0x158] sm:$0xff] }
  0x43   :  { %465 = vmatpush.msrb.mxu2 %v429_v52  ;;  %445 = vmatpush.msrb.mxu1 %v428_v54  ;;  %v606_v52 = vld [vmem:[#allocation7 + $0xc8] sm:$0xff] }
  0x45   :  { %466 = vmatpush.msrb.mxu2 %v428_v54  ;;  %446 = vmatpush.msrb.mxu1 %v427_v55  ;;  %v604_v54 = vld [vmem:[#allocation7 + $0xb8] sm:$0xff] }
  0x47   :  { %467 = vmatpush.msrb.mxu2 %v427_v55  ;;  %447 = vmatpush.msrb.mxu1 %v426_v56  ;;  %v603_v55 = vld [vmem:[#allocation7 + $0xb0] sm:$0xff] }
  0x49   :  { %468 = vmatpush.msrb.mxu2 %v426_v56  ;;  %448 = vmatpush.msrb.mxu1 %v425_v58  ;;  %v602_v56 = vld [vmem:[#allocation7 + $0xa8] sm:$0xff] }
  0x4a   :  { %879 = vmatmul.msk.f32.gmra.mxu2 %vm262_vm1, %v1232_v0  ;;  %v421_v0 = vld [vmem:[#allocation11] sm:$0xff] }
  0x4b   :  { %469 = vmatpush.msrb.mxu2 %v425_v58  ;;  %449 = vmatpush.msrb.mxu1 %v424_v59  ;;  %v600_v58 = vld [vmem:[#allocation7 + $0x98] sm:$0xff] }
  0x4d   :  { %470 = vmatpush.msrb.mxu2 %v424_v59  ;;  %450 = vmatpush.msrb.mxu1 %v423_v61 }
  0x4f   :  { %471 = vmatpush.msrb.mxu2 %v423_v61  ;;  %451 = vmatpush.msrb.mxu1 %v422_v63 }
  0x51   :  { %472 = vmatpush.msrb.mxu2 %v422_v63  ;;  %452 = vmatpush.msrb.mxu1 %v421_v0  ;;  %v597_v63 = vld [vmem:[#allocation7 + $0x80] sm:$0xff] }
  0x53   :  { %473 = vmatpush.msrb.mxu2 %v421_v0 }
  0xa3   :  { %v192_v36 = vpop.f32.mrf.mxu0  ;;  %v233_v37 = vpop.f32.mrf.mxu1 }
  0xa4   :  { %880 = vmatmul.msk.f32.vlgmr.msrb.gmra.mxu3 %vm262_vm1, %v192_v36  ;;  %884 = vmatmul.msk.f32.vlgmr.msrb.gmra.mxu0 %vm262_vm1, %v233_v37 }
  0xab   :  { %v195_v38 = vpop.f32.mrf.mxu0  ;;  %v236_v39 = vpop.f32.mrf.mxu1 }
  0xac   :  { %881 = vmatmul.msk.f32.gmra.mxu3 %vm262_vm1, %v195_v38  ;;  %885 = vmatmul.msk.f32.gmra.mxu0 %vm262_vm1, %v236_v39  ;;  %v198_v40 = vpop.f32.mrf.mxu3 }
  0xb3   :  { %v239_v41 = vpop.f32.mrf.mxu1 }
  0xb4   :  { %882 = vmatmul.msk.f32.gmra.mxu3 %vm262_vm1, %v198_v40  ;;  %886 = vmatmul.msk.f32.gmra.mxu0 %vm262_vm1, %v239_v41  ;;  %v201_v42 = vpop.f32.mrf.mxu3 }
  0xb5   :  { %v292_v51 = vpop.f32.mrf.mxu2 }
  0xbb   :  { %v242_v43 = vpop.f32.mrf.mxu1 }
  0xbc   :  { %883 = vmatmul.msk.f32.gmra.mxu3 %vm262_vm1, %v201_v42  ;;  %887 = vmatmul.msk.f32.gmra.mxu0 %vm262_vm1, %v242_v43 }
  0xbd   :  { %v295_v60 = vpop.f32.mrf.mxu2 }
  0xc5   :  { %v298_v2 = vpop.f32.mrf.mxu2 }
  0xcd   :  { %v301_v14 = vpop.f32.mrf.mxu2 }
 0x121   :  { %v383_v53 = vpop.f32.mrf.mxu0 }
 0x127   :  { %v333_v57 = vpop.f32.mrf.mxu3 }
 0x128   :  { %v334_v9 = vadd.f32 %v333_v57, %v292_v51  ;;  %v607_v51 = vld [vmem:[#allocation7 + $0xd0] sm:$0xff]  ;;  %v601_v57 = vld [vmem:[#allocation7 + $0xa0] sm:$0xff] }
 0x129   :  { %v386_v62 = vpop.f32.mrf.mxu0  ;;  %618 = vmatpush.msra.mxu0 %v607_v51  ;;  %v593_v51 = vld [vmem:[#allocation7 + $0x68] sm:$0xff] }
 0x12a   :  { %v1302_v12 = vadd.f32 %v383_v53, %v334_v9  ;;  %v605_v53 = vld [vmem:[#allocation7 + $0xc0] sm:$0xff] }
 0x12b   :  { %619 = vmatpush.msra.mxu0 %v606_v52  ;;  %v682_v52 = vld [vmem:[#allocation7 + $0x150] sm:$0xff] }
 0x12c   :  { %v408_v20 = vmul.f32 %v1302_v12, %v1302_v12 }
 0x12d   :  { %620 = vmatpush.msra.mxu0 %v605_v53  ;;  %v592_v53 = vld [vmem:[#allocation7 + $0x60] sm:$0xff] }
 0x12f   :  { %v336_v1 = vpop.f32.mrf.mxu3  ;;  %621 = vmatpush.msra.mxu0 %v604_v54  ;;  %v681_v54 = vld [vmem:[#allocation7 + $0x148] sm:$0xff] }
 0x130   :  { %v337_v4 = vadd.f32 %v336_v1, %v295_v60  ;;  %v599_v60 = vld [vmem:[#allocation7 + $0x90] sm:$0xff] }
 0x131   :  { %v389_v3 = vpop.f32.mrf.mxu0  ;;  %622 = vmatpush.msra.mxu0 %v603_v55  ;;  %v591_v55 = vld [vmem:[#allocation7 + $0x58] sm:$0xff] }
 0x132   :  { %v1300_v11 = vadd.f32 %v386_v62, %v337_v4  ;;  %v598_v62 = vld [vmem:[#allocation7 + $0x88] sm:$0xff] }
 0x133   :  { %623 = vmatpush.msra.mxu0 %v602_v56  ;;  %v680_v56 = vld [vmem:[#allocation7 + $0x140] sm:$0xff] }
 0x134   :  { %v409_v15 = vmul.f32 %v1300_v11, %v1300_v11  ;;  %v399_v21 = vadd.f32 %v1300_v11, %v1302_v12 }
 0x135   :  { %624 = vmatpush.msra.mxu0 %v601_v57  ;;  %v589_v57 = vld [vmem:[#allocation7 + $0x48] sm:$0xff] }
 0x136   :  { %v412_v25 = vadd.f32 %v409_v15, %v408_v20 }
 0x137   :  { %v339_v7 = vpop.f32.mrf.mxu3  ;;  %625 = vmatpush.msra.mxu0 %v600_v58  ;;  %v588_v58 = vld [vmem:[#allocation7 + $0x40] sm:$0xff] }
 0x138   :  { %v340_v10 = vadd.f32 %v339_v7, %v298_v2 }
 0x139   :  { %v392_v17 = vpop.f32.mrf.mxu0  ;;  %626 = vmatpush.msra.mxu0 %v599_v60  ;;  %v584_v60 = vld [vmem:[#allocation7 + $0x20] sm:$0xff] }
 0x13a   :  { %v1304_v13 = vadd.f32 %v389_v3, %v340_v10 }
 0x13b   :  { %627 = vmatpush.msra.mxu0 %v598_v62  ;;  %v678_v62 = vld [vmem:[#allocation7 + $0x130] sm:$0xff] }
 0x13c   :  { %v410_v23 = vmul.f32 %v1304_v13, %v1304_v13  ;;  %v400_v26 = vadd.f32 %v399_v21, %v1304_v13 }
 0x13d   :  { %628 = vmatpush.msra.mxu0 %v597_v63  ;;  %v581_v63 = vld [vmem:[#allocation7 + $0x8] sm:$0xff] }
 0x13e   :  { %v413_v30 = vadd.f32 %v412_v25, %v410_v23  ;;  %v910_v25 = vld [vmem:[%s1365_s7] ss:$0 sm:$0xff] }
 0x13f   :  { %v342_v16 = vpop.f32.mrf.mxu3 }
 0x140   :  { %v343_v24 = vadd.f32 %v342_v16, %v301_v14 }
 0x142   :  { %v1315_v29 = vadd.f32 %v392_v17, %v343_v24 }
 0x144   :  { %v401_v31 = vadd.f32 %v400_v26, %v1315_v29  ;;  %v411_v32 = vmul.f32 %v1315_v29, %v1315_v29 }
 0x146   :  { %v402_v33 = vrot.slane %v401_v31, 4  ;;  %v414_v34 = vadd.f32 %v413_v30, %v411_v32  ;;  %v911_v32 = vld [vmem:[%s1366_s8] ss:$0 sm:$0xff] }
 0x148   :  { %v403_v35 = vadd.f32 %v402_v33, %v401_v31  ;;  %v415_v36 = vrot.slane %v414_v34, 4 }
 0x14a   :  { %v404_v37 = vrot.slane %v403_v35, 2  ;;  %v416_v38 = vadd.f32 %v415_v36, %v414_v34 }
 0x14c   :  { %v405_v39 = vadd.f32 %v404_v37, %v403_v35  ;;  %v417_v40 = vrot.slane %v416_v38, 2 }
 0x14e   :  { %v406_v41 = vrot.slane %v405_v39, 1  ;;  %v418_v42 = vadd.f32 %v417_v40, %v416_v38 }
 0x150   :  { %v407_v43 = vadd.f32 %v406_v41, %v405_v39  ;;  %v419_v44 = vrot.slane %v418_v42, 1 }
 0x152   :  { %453 = vmatmul.f32.vlgmr.msrb.gmra.mxu1 %v407_v43  ;;  %v420_v45 = vadd.f32 %v419_v44, %v418_v42  ;;  %v687_v43 = vld [vmem:[#allocation7 + $0x178] sm:$0xff]  ;;  %v686_v44 = vld [vmem:[#allocation7 + $0x170] sm:$0xff] }
 0x153   :  { %688 = vmatpush.msra.mxu2 %v687_v43 }
 0x154   :  { %474 = vmatmul.f32.vlgmr.msrb.gmra.mxu2 %v420_v45 }
 0x155   :  { %689 = vmatpush.msra.mxu2 %v686_v44 }
 0x157   :  { %690 = vmatpush.msra.mxu2 %v685_v46 }
 0x159   :  { %691 = vmatpush.msra.mxu2 %v684_v48 }
 0x15b   :  { %692 = vmatpush.msra.mxu2 %v683_v50 }
 0x15d   :  { %693 = vmatpush.msra.mxu2 %v682_v52 }
 0x15f   :  { %694 = vmatpush.msra.mxu2 %v681_v54 }
 0x161   :  { %695 = vmatpush.msra.mxu2 %v680_v56 }
 0x1cf   :  { %v454_v59 = vpop.f32.mrf.mxu1 }
 0x1d0   :  { %v457_v61 = vmul.f32 0.03125, %v454_v59  ;;  %v587_v59 = vld [vmem:[#allocation7 + $0x38] sm:$0xff] }
 0x1d2   :  { %v479_v1 = vmul.f32 %v457_v61, %v457_v61  ;;  %v481_v15 = vperm.slane %v457_v61, 0  ;;  %v583_v61 = vld [vmem:[#allocation7 + $0x18] sm:$0xff] }
 0x1d4   :  { %v482_v20 = vsub.f32 %v1302_v12, %v481_v15  ;;  %v485_v23 = vsub.f32 %v1315_v29, %v481_v15  ;;  %v484_v26 = vsub.f32 %v1304_v13, %v481_v15  ;;  %v483_v30 = vsub.f32 %v1300_v11, %v481_v15 }
 0x1d7   :  { %v475_v0 = vpop.f32.mrf.mxu2 }
 0x1d8   :  { %v478_v2 = vmul.f32 0.03125, %v475_v0  ;;  %v676_v0 = vld [vmem:[#allocation7 + $0x120] sm:$0xff] }
 0x1da   :  { %v480_v3 = vsub.f32 %v478_v2, %v479_v1  ;;  %v580_v1 = vld [vmem:[#allocation7] sm:$0xff]  ;;  %v675_v2 = vld [vmem:[#allocation7 + $0x118] sm:$0xff] }
 0x1dc   :  { %v486_v4 = vadd.f32 1e-05, %v480_v3  ;;  %v673_v3 = vld [vmem:[#allocation7 + $0x108] sm:$0xff] }
 0x1de   :  { %914 = vrsqrt.f32 %v486_v4  ;;  %vm493_vm3 = vweird.f32 %v486_v4 }
 0x1e4   :  { %v915_v7 = vpop.eup %914 }
 0x1e5   :  { %v488_v9 = vmul.f32 %v915_v7, %v486_v4  ;;  %vm494_vm2 = vweird.f32 %v915_v7 }
 0x1e6   :  { %vm495_vm4 = vmor %vm493_vm3, %vm494_vm2 }
 0x1e7   :  { %v489_v10 = vmul.f32 %v915_v7, %v488_v9 }
 0x1e9   :  { %v490_v14 = vmul.f32 0.5, %v489_v10 }
 0x1eb   :  { %v491_v16 = vsub.f32 1.5, %v490_v14 }
 0x1ed   :  { %v492_v17 = vmul.f32 %v915_v7, %v491_v16 }
 0x1ef   :  { %v496_v21 = vsel %vm495_vm4, %v915_v7, %v492_v17 }
 0x1f0   :  { %v497_v24 = vperm.slane %v496_v21, 0  ;;  %v757_v21 = vld [vmem:[#allocation13 + $0x70] sm:$0xff] }
 0x1f2   :  { %v501_v31 = vmul.f32 %v497_v24, %v485_v23  ;;  %v498_v33 = vmul.f32 %v497_v24, %v482_v20  ;;  %v500_v34 = vmul.f32 %v497_v24, %v484_v26  ;;  %v499_v12 = vmul.f32 %v497_v24, %v483_v30  ;;  %v758_v20 = vld [vmem:[#allocation13 + $0x78] sm:$0xff]  ;;  %v756_v23 = vld [vmem:[#allocation13 + $0x68] sm:$0xff]  ;;  %v755_v24 = vld [vmem:[#allocation13 + $0x60] sm:$0xff] }
 0x1f3   :  { %780 = vmatpush.msrb.mxu0 %v758_v20  ;;  %v753_v26 = vld [vmem:[#allocation13 + $0x50] sm:$0xff]  ;;  %v752_v30 = vld [vmem:[#allocation13 + $0x48] sm:$0xff] }
 0x1f4   :  { %v508_v35 = vmul.f32 %v910_v25, %v501_v31  ;;  %v505_v36 = vmul.f32 %v910_v25, %v498_v33  ;;  %v507_v29 = vmul.f32 %v910_v25, %v500_v34  ;;  %v506_v37 = vmul.f32 %v910_v25, %v499_v12  ;;  %v754_v25 = vld [vmem:[#allocation13 + $0x58] sm:$0xff]  ;;  %v751_v33 = vld [vmem:[#allocation13 + $0x40] sm:$0xff]  ;;  %v749_v12 = vld [vmem:[#allocation13 + $0x30] sm:$0xff] }
 0x1f5   :  { %781 = vmatpush.msrb.mxu0 %v757_v21  ;;  %v750_v34 = vld [vmem:[#allocation13 + $0x38] sm:$0xff] }
 0x1f6   :  { %v515_v38 = vadd.f32 %v911_v32, %v508_v35  ;;  %v512_v39 = vadd.f32 %v911_v32, %v505_v36  ;;  %v514_v40 = vadd.f32 %v911_v32, %v507_v29  ;;  %v513_v13 = vadd.f32 %v911_v32, %v506_v37  ;;  %v748_v35 = vld [vmem:[#allocation13 + $0x28] sm:$0xff]  ;;  %v747_v37 = vld [vmem:[#allocation13 + $0x20] sm:$0xff] }
 0x1f7   :  { %782 = vmatpush.msrb.mxu0 %v756_v23 }
 0x1f8   :  { %v519_v41 = vmax.f32 %v515_v38, 0.0  ;;  %v516_v42 = vmax.f32 %v512_v39, 0.0  ;;  %v518_v11 = vmax.f32 %v514_v40, 0.0  ;;  %v517_v45 = vmax.f32 %v513_v13, 0.0  ;;  %v746_v39 = vld [vmem:[#allocation13 + $0x18] sm:$0xff]  ;;  %v745_v40 = vld [vmem:[#allocation13 + $0x10] sm:$0xff] }
 0x1f9   :  { %783 = vmatpush.msrb.mxu0 %v755_v24 }
 0x1fa   :  { %534 = vmatpush.msra.mxu1 %v519_v41  ;;  %563 = vmatpush.msra.mxu3 %v519_v41 }
 0x1fb   :  { %629 = vmatmul.f32.vlgmr.msra.gmra.mxu0 %v516_v42 }
 0x1fc   :  { %535 = vmatpush.msra.mxu1 %v518_v11  ;;  %564 = vmatpush.msra.mxu3 %v518_v11 }
 0x1fd   :  { %784 = vmatpush.msrb.mxu0 %v754_v25 }
 0x1fe   :  { %536 = vmatpush.msra.mxu1 %v517_v45  ;;  %565 = vmatpush.msra.mxu3 %v517_v45 }
 0x1ff   :  { %785 = vmatpush.msrb.mxu0 %v753_v26 }
 0x200   :  { %537 = vmatpush.msra.mxu1 %v516_v42  ;;  %566 = vmatpush.msra.mxu3 %v516_v42  ;;  %v743_v42 = vld [vmem:[#allocation13] sm:$0xff] }
 0x201   :  { %888 = vmatmul.msk.f32.vlgmr.msra.gmra.mxu1 %vm162_vm0, %v1247_v5  ;;  %892 = vmatmul.msk.f32.vlgmr.msra.gmra.mxu3 %vm162_vm0, %v1250_v6  ;;  %v590_v5 = vld [vmem:[#allocation7 + $0x50] sm:$0xff]  ;;  %v679_v6 = vld [vmem:[#allocation7 + $0x138] sm:$0xff] }
 0x202   :  { %642 = vmatpush.msrb.mxu1 %v595_v47  ;;  %696 = vmatpush.msra.mxu2 %v679_v6 }
 0x203   :  { %632 = vmatmul.f32.gmra.mxu0 %v517_v45  ;;  %759 = vmatpush.msrb.mxu3 %v758_v20 }
 0x204   :  { %643 = vmatpush.msrb.mxu1 %v594_v49  ;;  %697 = vmatpush.msra.mxu2 %v678_v62 }
 0x205   :  { %760 = vmatpush.msrb.mxu3 %v757_v21  ;;  %786 = vmatpush.msrb.mxu0 %v752_v30 }
 0x206   :  { %644 = vmatpush.msrb.mxu1 %v593_v51 }
 0x207   :  { %761 = vmatpush.msrb.mxu3 %v756_v23  ;;  %787 = vmatpush.msrb.mxu0 %v751_v33 }
 0x208   :  { %645 = vmatpush.msrb.mxu1 %v592_v53 }
 0x209   :  { %889 = vmatmul.msk.f32.gmra.mxu1 %vm162_vm0, %v1264_v18  ;;  %893 = vmatmul.msk.f32.gmra.mxu3 %vm162_vm0, %v1266_v19  ;;  %v586_v18 = vld [vmem:[#allocation7 + $0x30] sm:$0xff]  ;;  %v585_v19 = vld [vmem:[#allocation7 + $0x28] sm:$0xff] }
 0x20a   :  { %646 = vmatpush.msrb.mxu1 %v591_v55  ;;  %762 = vmatpush.msrb.mxu3 %v755_v24 }
 0x20b   :  { %635 = vmatmul.f32.gmra.mxu0 %v518_v11 }
 0x20c   :  { %647 = vmatpush.msrb.mxu1 %v590_v5  ;;  %763 = vmatpush.msrb.mxu3 %v754_v25 }
 0x20d   :  { %788 = vmatpush.msrb.mxu0 %v750_v34 }
 0x20e   :  { %648 = vmatpush.msrb.mxu1 %v589_v57  ;;  %764 = vmatpush.msrb.mxu3 %v753_v26 }
 0x20f   :  { %789 = vmatpush.msrb.mxu0 %v749_v12 }
 0x210   :  { %649 = vmatpush.msrb.mxu1 %v588_v58  ;;  %765 = vmatpush.msrb.mxu3 %v752_v30 }
 0x211   :  { %890 = vmatmul.msk.f32.gmra.mxu1 %vm162_vm0, %v1255_v8  ;;  %894 = vmatmul.msk.f32.gmra.mxu3 %vm162_vm0, %v1276_v27  ;;  %v582_v8 = vld [vmem:[#allocation7 + $0x10] sm:$0xff]  ;;  %v677_v27 = vld [vmem:[#allocation7 + $0x128] sm:$0xff] }
 0x212   :  { %650 = vmatpush.msrb.mxu1 %v587_v59  ;;  %698 = vmatpush.msra.mxu2 %v677_v27 }
 0x213   :  { %638 = vmatmul.f32.gmra.mxu0 %v519_v41  ;;  %766 = vmatpush.msrb.mxu3 %v751_v33  ;;  %v744_v41 = vld [vmem:[#allocation13 + $0x8] sm:$0xff] }
 0x214   :  { %651 = vmatpush.msrb.mxu1 %v586_v18  ;;  %699 = vmatpush.msra.mxu2 %v676_v0 }
 0x215   :  { %767 = vmatpush.msrb.mxu3 %v750_v34  ;;  %790 = vmatpush.msrb.mxu0 %v748_v35 }
 0x216   :  { %652 = vmatpush.msrb.mxu1 %v585_v19  ;;  %700 = vmatpush.msra.mxu2 %v675_v2 }
 0x217   :  { %768 = vmatpush.msrb.mxu3 %v749_v12  ;;  %791 = vmatpush.msrb.mxu0 %v747_v37 }
 0x218   :  { %653 = vmatpush.msrb.mxu1 %v584_v60 }
 0x219   :  { %891 = vmatmul.msk.f32.gmra.mxu1 %vm162_vm0, %v1268_v22  ;;  %895 = vmatmul.msk.f32.gmra.mxu3 %vm162_vm0, %v1280_v28  ;;  %v674_v22 = vld [vmem:[#allocation7 + $0x110] sm:$0xff]  ;;  %v672_v28 = vld [vmem:[#allocation7 + $0x100] sm:$0xff] }
 0x21a   :  { %654 = vmatpush.msrb.mxu1 %v583_v61  ;;  %701 = vmatpush.msra.mxu2 %v674_v22 }
 0x21b   :  { %769 = vmatpush.msrb.mxu3 %v748_v35  ;;  %792 = vmatpush.msrb.mxu0 %v746_v39 }
 0x21c   :  { %655 = vmatpush.msrb.mxu1 %v582_v8  ;;  %702 = vmatpush.msra.mxu2 %v673_v3 }
 0x21d   :  { %770 = vmatpush.msrb.mxu3 %v747_v37  ;;  %793 = vmatpush.msrb.mxu0 %v745_v40 }
 0x21e   :  { %656 = vmatpush.msrb.mxu1 %v581_v63  ;;  %703 = vmatpush.msra.mxu2 %v672_v28 }
 0x21f   :  { %771 = vmatpush.msrb.mxu3 %v746_v39  ;;  %794 = vmatpush.msrb.mxu0 %v744_v41 }
 0x220   :  { %657 = vmatpush.msrb.mxu1 %v580_v1 }
 0x221   :  { %772 = vmatpush.msrb.mxu3 %v745_v40  ;;  %795 = vmatpush.msrb.mxu0 %v743_v42 }
 0x223   :  { %773 = vmatpush.msrb.mxu3 %v744_v41  ;;  %v913_v41 = vld [vmem:[%s1368_s10] ss:$0 sm:$0xff] }
 0x225   :  { %774 = vmatpush.msrb.mxu3 %v743_v42 }
 0x278   :  { %v630_v32 = vpop.f32.mrf.mxu0 }
 0x27e   :  { %v539_v4 = vpop.f32.mrf.mxu1 }
 0x27f   :  { %658 = vmatmul.f32.vlgmr.msrb.gmra.mxu1 %v539_v4 }
 0x280   :  { %v633_v38 = vpop.f32.mrf.mxu0 }
 0x284   :  { %v568_v7 = vpop.f32.mrf.mxu3 }
 0x285   :  { %704 = vmatmul.f32.vlgmr.msra.gmra.mxu2 %v568_v7 }
 0x286   :  { %v542_v9 = vpop.f32.mrf.mxu1 }
 0x287   :  { %661 = vmatmul.f32.gmra.mxu1 %v542_v9 }
 0x288   :  { %v636_v43 = vpop.f32.mrf.mxu0 }
 0x28c   :  { %v571_v10 = vpop.f32.mrf.mxu3 }
 0x28d   :  { %707 = vmatmul.f32.gmra.mxu2 %v571_v10 }
 0x28e   :  { %v545_v14 = vpop.f32.mrf.mxu1 }
 0x28f   :  { %664 = vmatmul.f32.gmra.mxu1 %v545_v14 }
 0x290   :  { %v639_v53 = vpop.f32.mrf.mxu0 }
 0x294   :  { %v574_v15 = vpop.f32.mrf.mxu3 }
 0x295   :  { %710 = vmatmul.f32.gmra.mxu2 %v574_v15 }
 0x296   :  { %v548_v16 = vpop.f32.mrf.mxu1 }
 0x297   :  { %667 = vmatmul.f32.gmra.mxu1 %v548_v16 }
 0x29c   :  { %v577_v17 = vpop.f32.mrf.mxu3 }
 0x29d   :  { %713 = vmatmul.f32.gmra.mxu2 %v577_v17 }
 0x2fc   :  { %v659_v31 = vpop.f32.mrf.mxu1 }
 0x2fd   :  { %v660_v46 = vadd.f32 %v659_v31, %v630_v32 }
 0x304   :  { %v662_v36 = vpop.f32.mrf.mxu1 }
 0x305   :  { %v663_v44 = vadd.f32 %v662_v36, %v633_v38 }
 0x308   :  { %v705_v29 = vpop.f32.mrf.mxu2 }
 0x309   :  { %v717_v49 = vadd.f32 %v705_v29, %v660_v46  ;;  %v912_v29 = vld [vmem:[%s1367_s9] ss:$0 sm:$0xff]  ;;  %s1129_s9 = smov [#allocation14]  }
 0x30a   :  { %s850_s15 = sshll.u32 %s1129_s9, 4  ;;  %s851_s15 = int_to_ptr.vmem [resolvable:$true] %s850_s15 }
 0x30b   :  { %v730_v54 = vmul.f32 %v717_v49, %v717_v49 }
 0x30c   :  { %v665_v11 = vpop.f32.mrf.mxu1 }
 0x30d   :  { %v666_v47 = vadd.f32 %v665_v11, %v636_v43 }
 0x310   :  { %v708_v13 = vpop.f32.mrf.mxu2 }
 0x311   :  { %v718_v48 = vadd.f32 %v708_v13, %v663_v44 }
 0x313   :  { %v731_v52 = vmul.f32 %v718_v48, %v718_v48  ;;  %v721_v55 = vadd.f32 %v718_v48, %v717_v49 }
 0x314   :  { %v668_v51 = vpop.f32.mrf.mxu1 }
 0x315   :  { %v669_v56 = vadd.f32 %v668_v51, %v639_v53  ;;  %v734_v57 = vadd.f32 %v731_v52, %v730_v54 }
 0x318   :  { %v711_v45 = vpop.f32.mrf.mxu2 }
 0x319   :  { %v719_v50 = vadd.f32 %v711_v45, %v666_v47 }
 0x31b   :  { %v732_v5 = vmul.f32 %v719_v50, %v719_v50  ;;  %v722_v58 = vadd.f32 %v721_v55, %v719_v50 }
 0x31d   :  { %v735_v18 = vadd.f32 %v734_v57, %v732_v5 }
 0x320   :  { %v714_v6 = vpop.f32.mrf.mxu2 }
 0x321   :  { %v720_v59 = vadd.f32 %v714_v6, %v669_v56 }
 0x323   :  { %v723_v19 = vadd.f32 %v722_v58, %v720_v59  ;;  %v733_v60 = vmul.f32 %v720_v59, %v720_v59 }
 0x325   :  { %v724_v61 = vrot.slane %v723_v19, 4  ;;  %v736_v62 = vadd.f32 %v735_v18, %v733_v60 }
 0x327   :  { %v725_v8 = vadd.f32 %v724_v61, %v723_v19  ;;  %v737_v27 = vrot.slane %v736_v62, 4 }
 0x329   :  { %v726_v63 = vrot.slane %v725_v8, 2  ;;  %v738_v0 = vadd.f32 %v737_v27, %v736_v62 }
 0x32b   :  { %v727_v1 = vadd.f32 %v726_v63, %v725_v8  ;;  %v739_v2 = vrot.slane %v738_v0, 2 }
 0x32d   :  { %v728_v22 = vrot.slane %v727_v1, 1  ;;  %v740_v3 = vadd.f32 %v739_v2, %v738_v0 }
 0x32f   :  { %v729_v28 = vadd.f32 %v728_v22, %v727_v1  ;;  %v741_v4 = vrot.slane %v740_v3, 1 }
 0x331   :  { %775 = vmatmul.f32.vlgmr.msrb.gmra.mxu3 %v729_v28  ;;  %v742_v7 = vadd.f32 %v741_v4, %v740_v3 }
 0x333   :  { %796 = vmatmul.f32.vlgmr.msrb.gmra.mxu0 %v742_v7 }
 0x3b0   :  { %v797_v9 = vpop.f32.mrf.mxu0 }
 0x3b1   :  { %v800_v15 = vmul.f32 0.03125, %v797_v9 }
 0x3b4   :  { %v776_v10 = vpop.f32.mrf.mxu3 }
 0x3b5   :  { %v779_v14 = vmul.f32 0.03125, %v776_v10 }
 0x3b7   :  { %v801_v16 = vmul.f32 %v779_v14, %v779_v14  ;;  %v803_v26 = vperm.slane %v779_v14, 0 }
 0x3b9   :  { %v802_v17 = vsub.f32 %v800_v15, %v801_v16  ;;  %v804_v32 = vsub.f32 %v717_v49, %v803_v26  ;;  %v805_v34 = vsub.f32 %v718_v48, %v803_v26  ;;  %v806_v12 = vsub.f32 %v719_v50, %v803_v26 }
 0x3ba   :  { %v807_v35 = vsub.f32 %v720_v59, %v803_v26 }
 0x3bb   :  { %v808_v20 = vadd.f32 1e-05, %v802_v17 }
 0x3bd   :  { %916 = vrsqrt.f32 %v808_v20  ;;  %vm815_vm6 = vweird.f32 %v808_v20 }
 0x3c3   :  { %v917_v21 = vpop.eup %916 }
 0x3c4   :  { %v810_v23 = vmul.f32 %v917_v21, %v808_v20  ;;  %vm816_vm5 = vweird.f32 %v917_v21 }
 0x3c5   :  { %vm817_vm7 = vmor %vm815_vm6, %vm816_vm5 }
 0x3c6   :  { %v811_v24 = vmul.f32 %v917_v21, %v810_v23 }
 0x3c8   :  { %v812_v25 = vmul.f32 0.5, %v811_v24 }
 0x3ca   :  { %v813_v30 = vsub.f32 1.5, %v812_v25 }
 0x3cc   :  { %v814_v31 = vmul.f32 %v917_v21, %v813_v30 }
 0x3ce   :  { %v818_v33 = vsel %vm817_vm7, %v917_v21, %v814_v31 }
 0x3cf   :  { %v819_v36 = vperm.slane %v818_v33, 0 }
 0x3d1   :  { %v820_v37 = vmul.f32 %v819_v36, %v804_v32  ;;  %v821_v38 = vmul.f32 %v819_v36, %v805_v34  ;;  %v822_v39 = vmul.f32 %v819_v36, %v806_v12  ;;  %v823_v40 = vmul.f32 %v819_v36, %v807_v35 }
 0x3d3   :  { %v827_v42 = vmul.f32 %v912_v29, %v820_v37  ;;  %v828_v13 = vmul.f32 %v912_v29, %v821_v38  ;;  %v829_v11 = vmul.f32 %v912_v29, %v822_v39  ;;  %v830_v43 = vmul.f32 %v912_v29, %v823_v40 }
 0x3d5   :  { %v834_v44 = vadd.f32 %v913_v41, %v827_v42  ;;  %v835_v45 = vadd.f32 %v913_v41, %v828_v13  ;;  %v836_v46 = vadd.f32 %v913_v41, %v829_v11  ;;  %v837_v47 = vadd.f32 %v913_v41, %v830_v43 }
 0x3d7   :  { %v838_v48 = vmax.f32 %v834_v44, 0.0  ;;  %v839_v49 = vmax.f32 %v835_v45, 0.0  ;;  %v840_v50 = vmax.f32 %v836_v46, 0.0  ;;  %v841_v51 = vmax.f32 %v837_v47, 0.0 }
 0x3d9   :  { %842 = vst [vmem:[#allocation14] sm:$0xff] %v838_v48 }
 0x3da   :  { %843 = vst [vmem:[#allocation14 + $0x8] sm:$0xff] %v839_v49 }
 0x3db   :  { %844 = vst [vmem:[#allocation14 + $0x10] sm:$0xff] %v840_v50 }
 0x3dc   :  { %845 = vst [vmem:[#allocation14 + $0x18] sm:$0xff] %v841_v51 }
 0x3dd   :  { %858 = dma.vmem_to_hbm [thread:$0]  %s851_s15, 512, %s853_s17, [#allocation4], %s1121_s25, %s1121_s25, %s1122_s26  }
 0x3de   :  { %1118 = dma.done.wait [#allocation4], 512  }
 0x3df   :  { %1119 = vsyncadd [#allocation4], 4294966784 }
 0x3e0   :  { %863 = vsyncpa [#allocation3], 1 }
 0x3e1   :  { %864 = vsyncpa [#allocation6], 1 }
 0x3e2   :  { %865 = vsyncpa [#allocation9], 1 }
 0x3e3   :  { %866 = vsyncpa [#allocation12], 1 }
 0x3e4   :  { %867 = vsyncpa [#allocation4], 1 }

</bundles_post_ra>
